<compile_context>
chip_gen: v6e
topology: v6e:2x2x1
jax: 0.10.0
libtpu: 0.0.40
codegen_flags: <defaults>
</compile_context>

<pallas_src>
import functools

import jax
import jax.numpy as jnp
from jax.experimental import pallas as pl
from jax.experimental.pallas import tpu as pltpu

LANES = 128
SUBLANES = 8
CHUNK_ROWS = 256                     # multiple of 32 -> safe for all dtype packings
_MIB = 1024 * 1024
_INPUT_VMEM_BUDGET = 24 * _MIB       # 2 inputs x 2 buffers x tile must fit here


def _cdiv(a, b):
    return -(-a // b)


def _round_down(a, b):
    return (a // b) * b


def _l1_ref(m, images):
    """Plain-JAX reference / fast path (fused elementwise + reduce)."""
    return jnp.mean(jnp.abs(m.astype(jnp.float32) - images.astype(jnp.float32)))


def _default_nsplit():
    """2 accumulation splits on multi-TensorCore chips (v7x), else 1."""
    try:
        dev = jax.devices()[0]
        kind = (getattr(dev, "device_kind", "") or "").lower()
        if dev.platform == "tpu" and "v7" in kind:
            return 2
    except Exception:
        pass
    return 1


def _l1_partial_kernel(m_ref, t_ref, out_ref, *, n_chunks):
    """Accumulate per-(sublane, lane) partial sums of |m - t| into out_ref.

    m_ref, t_ref: (n_chunks * CHUNK_ROWS, 128) VMEM tiles in native dtype.
    out_ref:      (8, 128) f32 block; same block index across grid axis 1, so
                  it stays VMEM-resident and acts as the accumulator.
    """
    j = pl.program_id(1)

    @pl.when(j == 0)
    def _():
        out_ref[...] = jnp.zeros_like(out_ref)

    # Chunked accumulation (statically unrolled, static slices -> zero runtime
    # indexing cost): the live |diff| intermediate is at most CHUNK_ROWS x 128
    # f32 instead of the whole tile, so Mosaic never has to spill a
    # multi-hundred-vreg temporary to VMEM.
    acc = jnp.zeros((SUBLANES, LANES), jnp.float32)
    for c in range(n_chunks):
        a = m_ref[pl.ds(c * CHUNK_ROWS, CHUNK_ROWS), :].astype(jnp.float32)
        b = t_ref[pl.ds(c * CHUNK_ROWS, CHUNK_ROWS), :].astype(jnp.float32)
        d = jnp.abs(a - b)
        # Fold row groups onto the (8, 128) vreg shape: pure VPU adds, no XLU,
        # no scalar path in the steady state.
        acc = acc + d.reshape(-1, SUBLANES, LANES).sum(axis=0)
    out_ref[...] += acc


@functools.partial(jax.jit, static_argnames=("tile_rows", "nsplit", "small_bytes"))
def custom_loss(m, images, *, tile_rows=None, nsplit=None, small_bytes=256 * 1024):
    """Pallas implementation of CustomLoss.forward(M, images) -> scalar L1 loss."""
    assert m.shape == images.shape, "L1Loss expects matching shapes"
    n_elem = m.size                                  # static (trace-time) Python int
    itemsize = jnp.dtype(m.dtype).itemsize
    if nsplit is None:
        nsplit = _default_nsplit()

    rows_avail = n_elem // LANES                     # complete 128-lane rows

    # --- Fast path: tiny inputs, or element count not viewable as (rows, 128)
    # without a copy.  XLA's fused elementwise+reduce is as good or better here
    # and avoids the fixed pallas_call launch / pipeline-prologue cost.
    if (
        n_elem % LANES != 0
        or n_elem * itemsize < small_bytes
        or rows_avail < nsplit * CHUNK_ROWS
    ):
        return _l1_ref(m, images)

    # --- Static tiling arithmetic (all Python ints). --------------------------
    if tile_rows is None:
        # 4096 rows for f32, 8192 for bf16, 16384 for int8/fp8 (same bytes/tile).
        tile_rows = (4096 * 4) // max(1, itemsize)
    # Cap so 2 inputs x 2 pipeline buffers fit the VMEM budget on every chip gen.
    tr_cap = _round_down(_INPUT_VMEM_BUDGET // (4 * LANES * itemsize), CHUNK_ROWS)
    tile_rows = max(CHUNK_ROWS, min(_round_down(tile_rows, CHUNK_ROWS), tr_cap))

    rows_per_split = rows_avail // nsplit
    tiles_per_split = max(1, _cdiv(rows_per_split, tile_rows))
    # Rebalance tile rows (rounded down to the chunk granule) so tiles are
    # evenly sized and the uncovered tail stays small.
    tr = max(CHUNK_ROWS, _round_down(rows_per_split // tiles_per_split, CHUNK_ROWS))
    tr = min(tr, tile_rows)
    tiles_per_split = rows_per_split // tr
    rows_main = nsplit * tiles_per_split * tr        # aligned prefix done in-kernel
    n_chunks = tr // CHUNK_ROWS

    # --- Lane-dense (rows, 128) views: whole-array reshapes are free bitcasts
    # (n_elem % 128 == 0) — no pad, no copy of either input.
    m_flat = m.reshape(-1)
    t_flat = images.reshape(-1)
    m2 = m_flat.reshape(rows_avail, LANES)
    t2 = t_flat.reshape(rows_avail, LANES)

    in_map = lambda i, j: (i * tiles_per_split + j, 0)

    vmem_needed = 2 * 2 * tr * LANES * itemsize + 4 * _MIB
    vmem_limit = int(min(32 * _MIB, max(16 * _MIB, vmem_needed)))

    partials = pl.pallas_call(
        functools.partial(_l1_partial_kernel, n_chunks=n_chunks),
        out_shape=jax.ShapeDtypeStruct((nsplit * SUBLANES, LANES), jnp.float32),
        grid=(nsplit, tiles_per_split),
        in_specs=[
            pl.BlockSpec((tr, LANES), in_map),
            pl.BlockSpec((tr, LANES), in_map),
        ],
        out_specs=pl.BlockSpec((SUBLANES, LANES), lambda i, j: (i, 0)),
        compiler_params=pltpu.CompilerParams(
            # axis 0: independent splits (sharded across TensorCores where
            # available); axis 1: reduction axis carrying the accumulator.
            dimension_semantics=("parallel", "arbitrary"),
            vmem_limit_bytes=vmem_limit,
        ),
    )(m2, t2)

    total = jnp.sum(partials)

    # --- Tail: rows not covered by the aligned prefix (< nsplit*tile_rows rows).
    # Fused slice+abs+sum reads only the tail bytes — no full-array copy.
    main_elems = rows_main * LANES
    if main_elems < n_elem:
        total = total + jnp.sum(
            jnp.abs(
                m_flat[main_elems:].astype(jnp.float32)
                - t_flat[main_elems:].astype(jnp.float32)
            )
        )

    # NOTE: plain f32 accumulation (n_elem/(1024*nsplit) terms per slot); may
    # drift a few ULP vs PyTorch's reduction order on huge inputs — fine for a
    # loss value.
    return total * (1.0 / n_elem)


if __name__ == "__main__":
    key = jax.random.PRNGKey(0)
    k1, k2, k3, k4, k5, k6, k7, k8 = jax.random.split(key, 8)

    # 1) Pallas path: NCHW batch=2, channels=4, spatial=128 (f32, 512 KiB/input).
    M = jax.random.normal(k1, (2, 4, 128, 128), dtype=jnp.float32)
    images = jax.random.normal(k2, (2, 4, 128, 128), dtype=jnp.float32)
    loss = custom_loss(M, images)
    jax.block_until_ready(loss)
    ref = jnp.mean(jnp.abs(M - images))
    assert jnp.allclose(loss, ref, rtol=1e-5, atol=1e-6), (loss, ref)

    # 2) Pallas path with an uncovered row tail (rows_avail not a tile multiple).
    M2 = jax.random.normal(k3, (2, 4, 130, 128), dtype=jnp.float32)
    images2 = jax.random.normal(k4, (2, 4, 130, 128), dtype=jnp.float32)
    loss2 = custom_loss(M2, images2)
    jax.block_until_ready(loss2)
    ref2 = jnp.mean(jnp.abs(M2 - images2))
    assert jnp.allclose(loss2, ref2, rtol=1e-5, atol=1e-6), (loss2, ref2)

    # 3) Tiny input -> plain-JAX fast path.
    M3 = jax.random.normal(k5, (2, 4, 16, 16), dtype=jnp.float32)
    images3 = jax.random.normal(k6, (2, 4, 16, 16), dtype=jnp.float32)
    loss3 = custom_loss(M3, images3)
    jax.block_until_ready(loss3)
    ref3 = jnp.mean(jnp.abs(M3 - images3))
    assert jnp.allclose(loss3, ref3, rtol=1e-5, atol=1e-6), (loss3, ref3)

    # 4) Non-128-divisible element count -> fast path (no pad, no copy).
    M4 = jax.random.normal(k7, (3, 5, 17, 19), dtype=jnp.float32)
    images4 = jax.random.normal(k8, (3, 5, 17, 19), dtype=jnp.float32)
    loss4 = custom_loss(M4, images4)
    jax.block_until_ready(loss4)
    ref4 = jnp.mean(jnp.abs(M4 - images4))
    assert jnp.allclose(loss4, ref4, rtol=1e-5, atol=1e-6), (loss4, ref4)

    print("KERNEL_OK")
</pallas_src>

<mosaic_0001>
module attributes {stable_mosaic.version = 11 : i64} {
  func.func @_l1_partial_kernel(%arg0: i32, %arg1: i32, %arg2: memref<1024x128xf32, #tpu.memory_space<vmem>>, %arg3: memref<1024x128xf32, #tpu.memory_space<vmem>>, %arg4: memref<8x128xf32, #tpu.memory_space<vmem>>) attributes {dimension_semantics = [#tpu.dimension_semantics<parallel>, #tpu.dimension_semantics<arbitrary>], iteration_bounds = array<i64: 1, 1>, scalar_prefetch = 0 : i64, scratch_operands = 0 : i64, tpu.core_type = #tpu.core_type<tc>, window_params = [{transform_indices = @transform_0, window_bounds = array<i64: 1024, 128>}, {transform_indices = @transform_1, window_bounds = array<i64: 1024, 128>}, {transform_indices = @transform_2, window_bounds = array<i64: 8, 128>}]} {
    %c0_i32 = arith.constant 0 : i32
    %0 = arith.cmpi eq, %arg1, %c0_i32 : i32
    %1 = arith.extui %0 : i1 to i32
    %c0_i32_0 = arith.constant 0 : i32
    %2 = arith.cmpi ne, %1, %c0_i32_0 : i32
    scf.if %2 {
      %cst_21 = arith.constant 0.000000e+00 : f32
      %35 = vector.broadcast %cst_21 : f32 to vector<8x128xf32>
      %c0_22 = arith.constant 0 : index
      %c0_23 = arith.constant 0 : index
      %36 = vector.load %arg4[%c0_22, %c0_23] : memref<8x128xf32, #tpu.memory_space<vmem>>, vector<8x128xf32>
      tpu.vector_store %arg4[%c0_22, %c0_23], %35 {strides = array<i32>} : memref<8x128xf32, #tpu.memory_space<vmem>>, vector<8x128xf32>,
    } else {
    }
    %cst = arith.constant 0.000000e+00 : f32
    %3 = vector.broadcast %cst : f32 to vector<8x128xf32>
    %c0 = arith.constant 0 : index
    %c0_1 = arith.constant 0 : index
    %4 = vector.load %arg2[%c0, %c0_1] : memref<1024x128xf32, #tpu.memory_space<vmem>>, vector<256x128xf32>
    %c0_2 = arith.constant 0 : index
    %c0_3 = arith.constant 0 : index
    %5 = vector.load %arg3[%c0_2, %c0_3] : memref<1024x128xf32, #tpu.memory_space<vmem>>, vector<256x128xf32>
    %6 = arith.subf %4, %5 : vector<256x128xf32>
    %7 = math.absf %6 : vector<256x128xf32>
    %8 = vector.shape_cast %7 : vector<256x128xf32> to vector<32x8x128xf32>
    %cst_4 = arith.constant dense<0.000000e+00> : vector<8x128xf32>
    %9 = vector.multi_reduction <add>, %8, %cst_4 [0] : vector<32x8x128xf32> to vector<8x128xf32>
    %10 = arith.addf %3, %9 : vector<8x128xf32>
    %c256 = arith.constant 256 : index
    %c0_5 = arith.constant 0 : index
    %11 = vector.load %arg2[%c256, %c0_5] : memref<1024x128xf32, #tpu.memory_space<vmem>>, vector<256x128xf32>
    %c256_6 = arith.constant 256 : index
    %c0_7 = arith.constant 0 : index
    %12 = vector.load %arg3[%c256_6, %c0_7] : memref<1024x128xf32, #tpu.memory_space<vmem>>, vector<256x128xf32>
    %13 = arith.subf %11, %12 : vector<256x128xf32>
    %14 = math.absf %13 : vector<256x128xf32>
    %15 = vector.shape_cast %14 : vector<256x128xf32> to vector<32x8x128xf32>
    %cst_8 = arith.constant dense<0.000000e+00> : vector<8x128xf32>
    %16 = vector.multi_reduction <add>, %15, %cst_8 [0] : vector<32x8x128xf32> to vector<8x128xf32>
    %17 = arith.addf %10, %16 : vector<8x128xf32>
    %c512 = arith.constant 512 : index
    %c0_9 = arith.constant 0 : index
    %18 = vector.load %arg2[%c512, %c0_9] : memref<1024x128xf32, #tpu.memory_space<vmem>>, vector<256x128xf32>
    %c512_10 = arith.constant 512 : index
    %c0_11 = arith.constant 0 : index
    %19 = vector.load %arg3[%c512_10, %c0_11] : memref<1024x128xf32, #tpu.memory_space<vmem>>, vector<256x128xf32>
    %20 = arith.subf %18, %19 : vector<256x128xf32>
    %21 = math.absf %20 : vector<256x128xf32>
    %22 = vector.shape_cast %21 : vector<256x128xf32> to vector<32x8x128xf32>
    %cst_12 = arith.constant dense<0.000000e+00> : vector<8x128xf32>
    %23 = vector.multi_reduction <add>, %22, %cst_12 [0] : vector<32x8x128xf32> to vector<8x128xf32>
    %24 = arith.addf %17, %23 : vector<8x128xf32>
    %c768 = arith.constant 768 : index
    %c0_13 = arith.constant 0 : index
    %25 = vector.load %arg2[%c768, %c0_13] : memref<1024x128xf32, #tpu.memory_space<vmem>>, vector<256x128xf32>
    %c768_14 = arith.constant 768 : index
    %c0_15 = arith.constant 0 : index
    %26 = vector.load %arg3[%c768_14, %c0_15] : memref<1024x128xf32, #tpu.memory_space<vmem>>, vector<256x128xf32>
    %27 = arith.subf %25, %26 : vector<256x128xf32>
    %28 = math.absf %27 : vector<256x128xf32>
    %29 = vector.shape_cast %28 : vector<256x128xf32> to vector<32x8x128xf32>
    %cst_16 = arith.constant dense<0.000000e+00> : vector<8x128xf32>
    %30 = vector.multi_reduction <add>, %29, %cst_16 [0] : vector<32x8x128xf32> to vector<8x128xf32>
    %31 = arith.addf %24, %30 : vector<8x128xf32>
    %c0_17 = arith.constant 0 : index
    %c0_18 = arith.constant 0 : index
    %32 = vector.load %arg4[%c0_17, %c0_18] : memref<8x128xf32, #tpu.memory_space<vmem>>, vector<8x128xf32>
    %33 = arith.addf %32, %31 : vector<8x128xf32>
    %c0_19 = arith.constant 0 : index
    %c0_20 = arith.constant 0 : index
    %34 = vector.load %arg4[%c0_19, %c0_20] : memref<8x128xf32, #tpu.memory_space<vmem>>, vector<8x128xf32>
    tpu.vector_store %arg4[%c0_19, %c0_20], %33 {strides = array<i32>} : memref<8x128xf32, #tpu.memory_space<vmem>>, vector<8x128xf32>,
    return
  }
  func.func @transform_0(%arg0: i32, %arg1: i32) -> (i32, i32) {
    %c1_i32 = arith.constant 1 : i32
    %0 = arith.muli %arg0, %c1_i32 : i32
    %1 = arith.addi %0, %arg1 : i32
    %c0_i32 = arith.constant 0 : i32
    %c0_i32_0 = arith.constant 0 : i32
    return %1, %c0_i32 : i32, i32
  }
  func.func @transform_1(%arg0: i32, %arg1: i32) -> (i32, i32) {
    %c1_i32 = arith.constant 1 : i32
    %0 = arith.muli %arg0, %c1_i32 : i32
    %1 = arith.addi %0, %arg1 : i32
    %c0_i32 = arith.constant 0 : i32
    %c0_i32_0 = arith.constant 0 : i32
    return %1, %c0_i32 : i32, i32
  }
  func.func @transform_2(%arg0: i32, %arg1: i32) -> (i32, i32) {
    %c0_i32 = arith.constant 0 : i32
    %c0_i32_0 = arith.constant 0 : i32
    return %arg0, %c0_i32 : i32, i32
  }
}

</mosaic_0001>

<bundles_post_ra>
// kernel: custom_loss.1
= control target key start
LH: loop header
LB: loop body
LE: loop exit
PB: predicated region body
PF: predicated region fallthrough
CT: control target
= control target key end

     0   :  { %7 = vsyncpa [#allocation3], 0  ;;  %s788_s0 = inlined_call_operand.hbm [shape: f32[1024,128], index: 0, kind: input, shape index: {}]   ;;  %s789_s1 = inlined_call_operand.hbm [shape: f32[1024,128], index: 1, kind: input, shape index: {}]   ;;  %s790_s2 = inlined_call_operand.vmem [shape: f32[8,128], index: 2, kind: output, shape index: {}]  }
   0x1   :  { %8 = vsyncpa [#allocation5], 0  ;;  %s754_s9 = smov [#allocation2]  }
   0x2   :  { %s18_s10 = sshll.u32 %s754_s9, 4  ;;  %s19_s10 = int_to_ptr.vmem [resolvable:$true] %s18_s10 }
   0x3   :  { %s718_s11 = scalar_lea.vmem %s19_s10, 16384  ;;  %p723_p1 = scmp.lt.s32.totalorder %s19_s10, %s19_s10 }
   0x4   :  { %p719_p0 = scmp.ne.s32.totalorder %s19_s10, %s718_s11  ;;  %p724_p2 = scmp.lt.s32.totalorder %s718_s11, %s718_s11 }
   0x6   :  { %p725_p3 = por %p724_p2, %p723_p1 }
   0x8   :  { %p726_p4 = pnand %p725_p3, %p719_p0 }
   0xa   :  { %729 = shalt.err (!%p726_p4)
}
   0xb   :  { %s755_s12 = smov 128   ;;  %s756_s13 = smov 8  }
   0xc   :  { %24 = dma.hbm_to_vmem [thread:$0]  %s788_s0, 16384, %s19_s10, [#allocation3], %s755_s12, %s755_s12, %s756_s13  }
   0xd   :  { %s757_s16 = smov [#allocation4]  }
   0xe   :  { %s34_s17 = sshll.u32 %s757_s16, 4  ;;  %s35_s17 = int_to_ptr.vmem [resolvable:$true] %s34_s17 }
   0xf   :  { %s738_s18 = scalar_lea.vmem %s35_s17, 16384  ;;  %p743_p6 = scmp.lt.s32.totalorder %s35_s17, %s35_s17 }
  0x10   :  { %p739_p5 = scmp.ne.s32.totalorder %s35_s17, %s738_s18  ;;  %p744_p7 = scmp.lt.s32.totalorder %s738_s18, %s738_s18 }
  0x12   :  { %p745_p8 = por %p744_p7, %p743_p6 }
  0x14   :  { %p746_p9 = pnand %p745_p8, %p739_p5 }
  0x16   :  { %749 = shalt.err (!%p746_p9)
}
  0x17   :  { %40 = dma.hbm_to_vmem [thread:$0]  %s789_s1, 16384, %s35_s17, [#allocation5], %s755_s12, %s755_s12, %s756_s13  }
  0x18   :  { %750 = dma.done.wait [#allocation3], 16384  }
  0x19   :  { %751 = vsyncadd [#allocation3], 4294950912 }
  0x1a   :  { %752 = dma.done.wait [#allocation5], 16384  }
  0x1b   :  { %753 = vsyncadd [#allocation5], 4294950912  ;;  %v56_v0 = vld [vmem:[#allocation2] sm:$0xff]  ;;  %v57_v1 = vld [vmem:[#allocation2 + $0x8] sm:$0xff] }
  0x1c   :  { %v88_v2 = vld [vmem:[#allocation4] sm:$0xff]  ;;  %v89_v3 = vld [vmem:[#allocation4 + $0x8] sm:$0xff]  ;;  %v58_v6 = vld [vmem:[#allocation2 + $0x10] sm:$0xff] }
  0x1d   :  { %v120_v4 = vsub.f32 %v56_v0, %v88_v2  ;;  %v121_v5 = vsub.f32 %v57_v1, %v89_v3  ;;  %v90_v7 = vld [vmem:[#allocation4 + $0x10] sm:$0xff]  ;;  %v59_v8 = vld [vmem:[#allocation2 + $0x18] sm:$0xff]  ;;  %v216_v13 = vld [vmem:[#allocation2 + $0x100] sm:$0xff] }
  0x1e   :  { %v91_v9 = vld [vmem:[#allocation4 + $0x18] sm:$0xff]  ;;  %v122_v10 = vsub.f32 %v58_v6, %v90_v7  ;;  %v217_v14 = vld [vmem:[#allocation2 + $0x108] sm:$0xff]  ;;  %v248_v15 = vld [vmem:[#allocation4 + $0x100] sm:$0xff] }
  0x1f   :  { %v152_v11 = vand.u32 2147483647, %v120_v4  ;;  %v153_v12 = vand.u32 2147483647, %v121_v5  ;;  %v249_v16 = vld [vmem:[#allocation4 + $0x108] sm:$0xff]  ;;  %v123_v17 = vsub.f32 %v59_v8, %v91_v9  ;;  %v218_v18 = vld [vmem:[#allocation2 + $0x110] sm:$0xff]  ;;  %v280_v24 = vsub.f32 %v216_v13, %v248_v15 }
  0x20   :  { %v250_v19 = vld [vmem:[#allocation4 + $0x110] sm:$0xff]  ;;  %v60_v20 = vld [vmem:[#allocation2 + $0x20] sm:$0xff]  ;;  %v154_v22 = vand.u32 2147483647, %v122_v10  ;;  %v281_v25 = vsub.f32 %v217_v14, %v249_v16  ;;  %v219_v26 = vld [vmem:[#allocation2 + $0x118] sm:$0xff] }
  0x21   :  { %v92_v21 = vld [vmem:[#allocation4 + $0x20] sm:$0xff]  ;;  %v184_v23 = vadd.f32 %v153_v12, %v152_v11  ;;  %v251_v27 = vld [vmem:[#allocation4 + $0x118] sm:$0xff]  ;;  %v282_v28 = vsub.f32 %v218_v18, %v250_v19  ;;  %v155_v30 = vand.u32 2147483647, %v123_v17  ;;  %v61_v33 = vld [vmem:[#allocation2 + $0x28] sm:$0xff] }
  0x22   :  { %v124_v29 = vsub.f32 %v60_v20, %v92_v21  ;;  %v220_v31 = vld [vmem:[#allocation2 + $0x120] sm:$0xff]  ;;  %v93_v34 = vld [vmem:[#allocation4 + $0x28] sm:$0xff]  ;;  %v283_v36 = vsub.f32 %v219_v26, %v251_v27  ;;  %v312_v37 = vand.u32 2147483647, %v280_v24  ;;  %v313_v38 = vand.u32 2147483647, %v281_v25 }
  0x23   :  { %v252_v32 = vld [vmem:[#allocation4 + $0x120] sm:$0xff]  ;;  %v185_v35 = vadd.f32 %v184_v23, %v154_v22  ;;  %v221_v39 = vld [vmem:[#allocation2 + $0x128] sm:$0xff]  ;;  %v314_v42 = vand.u32 2147483647, %v282_v28  ;;  %v125_v43 = vsub.f32 %v61_v33, %v93_v34  ;;  %v62_v45 = vld [vmem:[#allocation2 + $0x30] sm:$0xff] }
  0x24   :  { %v253_v40 = vld [vmem:[#allocation4 + $0x128] sm:$0xff]  ;;  %v284_v41 = vsub.f32 %v220_v31, %v252_v32  ;;  %v156_v44 = vand.u32 2147483647, %v124_v29  ;;  %v94_v46 = vld [vmem:[#allocation4 + $0x30] sm:$0xff]  ;;  %v315_v49 = vand.u32 2147483647, %v283_v36  ;;  %v344_v50 = vadd.f32 %v313_v38, %v312_v37 }
  0x25   :  { %v186_v47 = vadd.f32 %v185_v35, %v155_v30  ;;  %v285_v48 = vsub.f32 %v221_v39, %v253_v40  ;;  %v222_v51 = vld [vmem:[#allocation2 + $0x130] sm:$0xff]  ;;  %v126_v55 = vsub.f32 %v62_v45, %v94_v46  ;;  %v157_v56 = vand.u32 2147483647, %v125_v43  ;;  %v63_v57 = vld [vmem:[#allocation2 + $0x38] sm:$0xff]  ;;  %v64_v4 = vld [vmem:[#allocation2 + $0x40] sm:$0xff] }
  0x26   :  { %v254_v52 = vld [vmem:[#allocation4 + $0x130] sm:$0xff]  ;;  %v316_v53 = vand.u32 2147483647, %v284_v41  ;;  %v345_v54 = vadd.f32 %v344_v50, %v314_v42  ;;  %v95_v58 = vld [vmem:[#allocation4 + $0x38] sm:$0xff]  ;;  %v96_v5 = vld [vmem:[#allocation4 + $0x40] sm:$0xff] }
  0x27   :  { %v187_v59 = vadd.f32 %v186_v47, %v156_v44  ;;  %v286_v60 = vsub.f32 %v222_v51, %v254_v52  ;;  %v317_v61 = vand.u32 2147483647, %v285_v48  ;;  %v223_v63 = vld [vmem:[#allocation2 + $0x138] sm:$0xff]  ;;  %v127_v2 = vsub.f32 %v63_v57, %v95_v58  ;;  %v224_v10 = vld [vmem:[#allocation2 + $0x140] sm:$0xff]  ;;  %v65_v14 = vld [vmem:[#allocation2 + $0x48] sm:$0xff] }
  0x28   :  { %v346_v62 = vadd.f32 %v345_v54, %v315_v49  ;;  %v255_v0 = vld [vmem:[#allocation4 + $0x138] sm:$0xff]  ;;  %v158_v3 = vand.u32 2147483647, %v126_v55  ;;  %v256_v11 = vld [vmem:[#allocation4 + $0x140] sm:$0xff]  ;;  %v128_v12 = vsub.f32 %v64_v4, %v96_v5  ;;  %v97_v15 = vld [vmem:[#allocation4 + $0x48] sm:$0xff] }
  0x29   :  { %v188_v6 = vadd.f32 %v187_v59, %v157_v56  ;;  %v287_v7 = vsub.f32 %v223_v63, %v255_v0  ;;  %v318_v8 = vand.u32 2147483647, %v286_v60  ;;  %v159_v13 = vand.u32 2147483647, %v127_v2  ;;  %v225_v20 = vld [vmem:[#allocation2 + $0x148] sm:$0xff]  ;;  %v66_v24 = vld [vmem:[#allocation2 + $0x50] sm:$0xff] }
  0x2a   :  { %v347_v1 = vadd.f32 %v346_v62, %v316_v53  ;;  %v288_v17 = vsub.f32 %v224_v10, %v256_v11  ;;  %v257_v21 = vld [vmem:[#allocation4 + $0x148] sm:$0xff]  ;;  %v129_v22 = vsub.f32 %v65_v14, %v97_v15  ;;  %v160_v23 = vand.u32 2147483647, %v128_v12  ;;  %v98_v25 = vld [vmem:[#allocation4 + $0x50] sm:$0xff]  ;;  %v67_v34 = vld [vmem:[#allocation2 + $0x58] sm:$0xff] }
  0x2b   :  { %v189_v16 = vadd.f32 %v188_v6, %v158_v3  ;;  %v319_v18 = vand.u32 2147483647, %v287_v7  ;;  %v289_v27 = vsub.f32 %v225_v20, %v257_v21  ;;  %v226_v30 = vld [vmem:[#allocation2 + $0x150] sm:$0xff]  ;;  %v130_v32 = vsub.f32 %v66_v24, %v98_v25  ;;  %v99_v35 = vld [vmem:[#allocation4 + $0x58] sm:$0xff]  ;;  %v376_v42 = vld [vmem:[#allocation2 + $0x200] sm:$0xff] }
  0x2c   :  { %v348_v9 = vadd.f32 %v347_v1, %v317_v61  ;;  %v320_v28 = vand.u32 2147483647, %v288_v17  ;;  %v258_v31 = vld [vmem:[#allocation4 + $0x150] sm:$0xff]  ;;  %v161_v33 = vand.u32 2147483647, %v129_v22  ;;  %v227_v40 = vld [vmem:[#allocation2 + $0x158] sm:$0xff]  ;;  %v131_v47 = vsub.f32 %v67_v34, %v99_v35 }
  0x2d   :  { %v190_v26 = vadd.f32 %v189_v16, %v159_v13  ;;  %v290_v37 = vsub.f32 %v226_v30, %v258_v31  ;;  %v321_v38 = vand.u32 2147483647, %v289_v27  ;;  %v259_v41 = vld [vmem:[#allocation4 + $0x158] sm:$0xff]  ;;  %v377_v43 = vld [vmem:[#allocation2 + $0x208] sm:$0xff]  ;;  %v408_v44 = vld [vmem:[#allocation4 + $0x200] sm:$0xff] }
  0x2e   :  { %v349_v19 = vadd.f32 %v348_v9, %v318_v8  ;;  %v409_v45 = vld [vmem:[#allocation4 + $0x208] sm:$0xff]  ;;  %v68_v46 = vld [vmem:[#allocation2 + $0x60] sm:$0xff]  ;;  %v162_v48 = vand.u32 2147483647, %v130_v32  ;;  %v291_v51 = vsub.f32 %v227_v40, %v259_v41  ;;  %v378_v54 = vld [vmem:[#allocation2 + $0x210] sm:$0xff]  ;;  %v440_v58 = vsub.f32 %v376_v42, %v408_v44 }
  0x2f   :  { %v191_v36 = vadd.f32 %v190_v26, %v160_v23  ;;  %v100_v49 = vld [vmem:[#allocation4 + $0x60] sm:$0xff]  ;;  %v322_v52 = vand.u32 2147483647, %v290_v37  ;;  %v410_v55 = vld [vmem:[#allocation4 + $0x210] sm:$0xff]  ;;  %v441_v59 = vsub.f32 %v377_v43, %v409_v45  ;;  %v379_v60 = vld [vmem:[#allocation2 + $0x218] sm:$0xff] }
  0x30   :  { %v350_v29 = vadd.f32 %v349_v19, %v319_v18  ;;  %v228_v56 = vld [vmem:[#allocation2 + $0x160] sm:$0xff]  ;;  %v411_v61 = vld [vmem:[#allocation4 + $0x218] sm:$0xff]  ;;  %v69_v62 = vld [vmem:[#allocation2 + $0x68] sm:$0xff]  ;;  %v132_v63 = vsub.f32 %v68_v46, %v100_v49  ;;  %v163_v0 = vand.u32 2147483647, %v131_v47  ;;  %v442_v1 = vsub.f32 %v378_v54, %v410_v55 }
  0x31   :  { %v192_v50 = vadd.f32 %v191_v36, %v161_v33  ;;  %v260_v57 = vld [vmem:[#allocation4 + $0x160] sm:$0xff]  ;;  %v101_v2 = vld [vmem:[#allocation4 + $0x68] sm:$0xff]  ;;  %v323_v5 = vand.u32 2147483647, %v291_v51  ;;  %v443_v11 = vsub.f32 %v379_v60, %v411_v61  ;;  %v472_v12 = vand.u32 2147483647, %v440_v58 }
  0x32   :  { %v351_v39 = vadd.f32 %v350_v29, %v320_v28  ;;  %v292_v4 = vsub.f32 %v228_v56, %v260_v57  ;;  %v380_v7 = vld [vmem:[#allocation2 + $0x220] sm:$0xff]  ;;  %v229_v9 = vld [vmem:[#allocation2 + $0x168] sm:$0xff]  ;;  %v473_v13 = vand.u32 2147483647, %v441_v59  ;;  %v70_v16 = vld [vmem:[#allocation2 + $0x70] sm:$0xff]  ;;  %v133_v18 = vsub.f32 %v69_v62, %v101_v2 }
  0x33   :  { %v193_v3 = vadd.f32 %v192_v50, %v162_v48  ;;  %v412_v8 = vld [vmem:[#allocation4 + $0x220] sm:$0xff]  ;;  %v261_v10 = vld [vmem:[#allocation4 + $0x168] sm:$0xff]  ;;  %v102_v17 = vld [vmem:[#allocation4 + $0x70] sm:$0xff]  ;;  %v164_v19 = vand.u32 2147483647, %v132_v63 }
  0x34   :  { %v352_v53 = vadd.f32 %v351_v39, %v321_v38  ;;  %v381_v14 = vld [vmem:[#allocation2 + $0x228] sm:$0xff]  ;;  %v444_v20 = vsub.f32 %v380_v7, %v412_v8  ;;  %v474_v21 = vand.u32 2147483647, %v442_v1  ;;  %v293_v23 = vsub.f32 %v229_v9, %v261_v10  ;;  %v382_v26 = vld [vmem:[#allocation2 + $0x230] sm:$0xff]  ;;  %v383_v34 = vld [vmem:[#allocation2 + $0x238] sm:$0xff] }
  0x35   :  { %v413_v15 = vld [vmem:[#allocation4 + $0x228] sm:$0xff]  ;;  %v194_v22 = vadd.f32 %v193_v3, %v163_v0  ;;  %v324_v24 = vand.u32 2147483647, %v292_v4  ;;  %v414_v27 = vld [vmem:[#allocation4 + $0x230] sm:$0xff]  ;;  %v475_v31 = vand.u32 2147483647, %v443_v11  ;;  %v504_v32 = vadd.f32 %v473_v13, %v472_v12 }
  0x36   :  { %v353_v6 = vadd.f32 %v352_v53, %v322_v52  ;;  %v230_v28 = vld [vmem:[#allocation2 + $0x170] sm:$0xff]  ;;  %v445_v30 = vsub.f32 %v381_v14, %v413_v15  ;;  %v134_v33 = vsub.f32 %v70_v16, %v102_v17  ;;  %v415_v35 = vld [vmem:[#allocation4 + $0x238] sm:$0xff]  ;;  %v165_v38 = vand.u32 2147483647, %v133_v18  ;;  %v384_v46 = vld [vmem:[#allocation2 + $0x240] sm:$0xff] }
  0x37   :  { %v262_v29 = vld [vmem:[#allocation4 + $0x170] sm:$0xff]  ;;  %v71_v36 = vld [vmem:[#allocation2 + $0x78] sm:$0xff]  ;;  %v446_v39 = vsub.f32 %v382_v26, %v414_v27  ;;  %v476_v40 = vand.u32 2147483647, %v444_v20  ;;  %v505_v41 = vadd.f32 %v504_v32, %v474_v21  ;;  %v195_v42 = vadd.f32 %v194_v22, %v164_v19  ;;  %v416_v47 = vld [vmem:[#allocation4 + $0x240] sm:$0xff] }
  0x38   :  { %v354_v25 = vadd.f32 %v353_v6, %v323_v5  ;;  %v103_v37 = vld [vmem:[#allocation4 + $0x78] sm:$0xff]  ;;  %v294_v43 = vsub.f32 %v230_v28, %v262_v29  ;;  %v325_v44 = vand.u32 2147483647, %v293_v23  ;;  %v447_v50 = vsub.f32 %v383_v34, %v415_v35  ;;  %v385_v54 = vld [vmem:[#allocation2 + $0x248] sm:$0xff]  ;;  %v72_v56 = vld [vmem:[#allocation2 + $0x80] sm:$0xff] }
  0x39   :  { %v231_v48 = vld [vmem:[#allocation2 + $0x178] sm:$0xff]  ;;  %v477_v51 = vand.u32 2147483647, %v445_v30  ;;  %v506_v52 = vadd.f32 %v505_v41, %v475_v31  ;;  %v135_v53 = vsub.f32 %v71_v36, %v103_v37  ;;  %v417_v55 = vld [vmem:[#allocation4 + $0x248] sm:$0xff]  ;;  %v104_v57 = vld [vmem:[#allocation4 + $0x80] sm:$0xff]  ;;  %v448_v59 = vsub.f32 %v384_v46, %v416_v47 }
  0x3a   :  { %v355_v45 = vadd.f32 %v354_v25, %v324_v24  ;;  %v263_v49 = vld [vmem:[#allocation4 + $0x178] sm:$0xff]  ;;  %v166_v58 = vand.u32 2147483647, %v134_v33  ;;  %v478_v60 = vand.u32 2147483647, %v446_v39  ;;  %v196_v62 = vadd.f32 %v195_v42, %v165_v38  ;;  %v386_v2 = vld [vmem:[#allocation2 + $0x250] sm:$0xff] }
  0x3b   :  { %v507_v61 = vadd.f32 %v506_v52, %v476_v40  ;;  %v295_v63 = vsub.f32 %v231_v48, %v263_v49  ;;  %v326_v0 = vand.u32 2147483647, %v294_v43  ;;  %v418_v3 = vld [vmem:[#allocation4 + $0x250] sm:$0xff]  ;;  %v232_v4 = vld [vmem:[#allocation2 + $0x180] sm:$0xff]  ;;  %v449_v6 = vsub.f32 %v385_v54, %v417_v55  ;;  %v387_v10 = vld [vmem:[#allocation2 + $0x258] sm:$0xff] }
  0x3c   :  { %v356_v1 = vadd.f32 %v355_v45, %v325_v44  ;;  %v264_v5 = vld [vmem:[#allocation4 + $0x180] sm:$0xff]  ;;  %v479_v7 = vand.u32 2147483647, %v447_v50  ;;  %v136_v9 = vsub.f32 %v72_v56, %v104_v57  ;;  %v419_v11 = vld [vmem:[#allocation4 + $0x258] sm:$0xff]  ;;  %v73_v12 = vld [vmem:[#allocation2 + $0x88] sm:$0xff]  ;;  %v450_v15 = vsub.f32 %v386_v2, %v418_v3 }
  0x3d   :  { %v508_v8 = vadd.f32 %v507_v61, %v477_v51  ;;  %v105_v13 = vld [vmem:[#allocation4 + $0x88] sm:$0xff]  ;;  %v167_v14 = vand.u32 2147483647, %v135_v53  ;;  %v480_v16 = vand.u32 2147483647, %v448_v59  ;;  %v197_v18 = vadd.f32 %v196_v62, %v166_v58  ;;  %v388_v22 = vld [vmem:[#allocation2 + $0x260] sm:$0xff] }
  0x3e   :  { %v296_v19 = vsub.f32 %v232_v4, %v264_v5  ;;  %v327_v20 = vand.u32 2147483647, %v295_v63  ;;  %v357_v21 = vadd.f32 %v356_v1, %v326_v0  ;;  %v420_v23 = vld [vmem:[#allocation4 + $0x260] sm:$0xff]  ;;  %v233_v24 = vld [vmem:[#allocation2 + $0x188] sm:$0xff]  ;;  %v451_v26 = vsub.f32 %v387_v10, %v419_v11  ;;  %v74_v32 = vld [vmem:[#allocation2 + $0x90] sm:$0xff] }
  0x3f   :  { %v509_v17 = vadd.f32 %v508_v8, %v478_v60  ;;  %v265_v25 = vld [vmem:[#allocation4 + $0x188] sm:$0xff]  ;;  %v481_v27 = vand.u32 2147483647, %v449_v6  ;;  %v137_v29 = vsub.f32 %v73_v12, %v105_v13  ;;  %v106_v33 = vld [vmem:[#allocation4 + $0x90] sm:$0xff]  ;;  %v168_v34 = vand.u32 2147483647, %v136_v9 }
  0x40   :  { %v389_v30 = vld [vmem:[#allocation2 + $0x268] sm:$0xff]  ;;  %v452_v35 = vsub.f32 %v388_v22, %v420_v23  ;;  %v482_v36 = vand.u32 2147483647, %v450_v15  ;;  %v198_v38 = vadd.f32 %v197_v18, %v167_v14  ;;  %v297_v39 = vsub.f32 %v233_v24, %v265_v25  ;;  %v390_v42 = vld [vmem:[#allocation2 + $0x270] sm:$0xff]  ;;  %v75_v49 = vld [vmem:[#allocation2 + $0x98] sm:$0xff] }
  0x41   :  { %v510_v28 = vadd.f32 %v509_v17, %v479_v7  ;;  %v421_v31 = vld [vmem:[#allocation4 + $0x268] sm:$0xff]  ;;  %v328_v40 = vand.u32 2147483647, %v296_v19  ;;  %v358_v41 = vadd.f32 %v357_v21, %v327_v20  ;;  %v422_v43 = vld [vmem:[#allocation4 + $0x270] sm:$0xff]  ;;  %v483_v47 = vand.u32 2147483647, %v451_v26 }
  0x42   :  { %v234_v44 = vld [vmem:[#allocation2 + $0x190] sm:$0xff]  ;;  %v453_v46 = vsub.f32 %v389_v30, %v421_v31  ;;  %v138_v50 = vsub.f32 %v74_v32, %v106_v33  ;;  %v391_v51 = vld [vmem:[#allocation2 + $0x278] sm:$0xff]  ;;  %v169_v54 = vand.u32 2147483647, %v137_v29  ;;  %v454_v56 = vsub.f32 %v390_v42, %v422_v43  ;;  %v392_v0 = vld [vmem:[#allocation2 + $0x280] sm:$0xff] }
  0x43   :  { %v511_v37 = vadd.f32 %v510_v28, %v480_v16  ;;  %v266_v45 = vld [vmem:[#allocation4 + $0x190] sm:$0xff]  ;;  %v423_v52 = vld [vmem:[#allocation4 + $0x278] sm:$0xff]  ;;  %v484_v57 = vand.u32 2147483647, %v452_v35  ;;  %v199_v59 = vadd.f32 %v198_v38, %v168_v34  ;;  %v329_v62 = vand.u32 2147483647, %v297_v39 }
  0x44   :  { %v107_v53 = vld [vmem:[#allocation4 + $0x98] sm:$0xff]  ;;  %v298_v61 = vsub.f32 %v234_v44, %v266_v45  ;;  %v359_v63 = vadd.f32 %v358_v41, %v328_v40  ;;  %v424_v1 = vld [vmem:[#allocation4 + $0x280] sm:$0xff]  ;;  %v393_v4 = vld [vmem:[#allocation2 + $0x288] sm:$0xff]  ;;  %v455_v6 = vsub.f32 %v391_v51, %v423_v52  ;;  %v485_v7 = vand.u32 2147483647, %v453_v46 }
  0x45   :  { %v512_v48 = vadd.f32 %v511_v37, %v481_v27  ;;  %v235_v55 = vld [vmem:[#allocation2 + $0x198] sm:$0xff]  ;;  %v779_v2 = vld [vmem:[#allocation2 + $0xa0] sm:$0xff]  ;;  %v425_v5 = vld [vmem:[#allocation4 + $0x288] sm:$0xff]  ;;  %v139_v10 = vsub.f32 %v75_v49, %v107_v53  ;;  %v170_v11 = vand.u32 2147483647, %v138_v50  ;;  %v456_v17 = vsub.f32 %v392_v0, %v424_v1 }
  0x46   :  { %v267_v60 = vld [vmem:[#allocation4 + $0x198] sm:$0xff]  ;;  %v781_v3 = vld [vmem:[#allocation4 + $0xa0] sm:$0xff]  ;;  %v537_v12 = vld [vmem:[#allocation2 + $0x308] sm:$0xff]  ;;  %v486_v18 = vand.u32 2147483647, %v454_v56  ;;  %v200_v22 = vadd.f32 %v199_v59, %v169_v54  ;;  %v360_v25 = vadd.f32 %v359_v63, %v329_v62  ;;  %v457_v28 = vsub.f32 %v393_v4, %v425_v5 }
  0x47   :  { %v513_v58 = vadd.f32 %v512_v48, %v482_v36  ;;  %v536_v9 = vld [vmem:[#allocation2 + $0x300] sm:$0xff]  ;;  %v569_v14 = vld [vmem:[#allocation4 + $0x308] sm:$0xff]  ;;  %v299_v16 = vsub.f32 %v235_v55, %v267_v60  ;;  %v538_v20 = vld [vmem:[#allocation2 + $0x310] sm:$0xff]  ;;  %v330_v24 = vand.u32 2147483647, %v298_v61  ;;  %v140_v37 = vsub.f32 %v779_v2, %v781_v3 }
  0x48   :  { %v568_v13 = vld [vmem:[#allocation4 + $0x300] sm:$0xff]  ;;  %v570_v21 = vld [vmem:[#allocation4 + $0x310] sm:$0xff]  ;;  %v487_v29 = vand.u32 2147483647, %v455_v6  ;;  %v539_v31 = vld [vmem:[#allocation2 + $0x318] sm:$0xff]  ;;  %v601_v34 = vsub.f32 %v537_v12, %v569_v14  ;;  %v201_v48 = vadd.f32 %v200_v22, %v170_v11 }
  0x49   :  { %v514_v8 = vadd.f32 %v513_v58, %v483_v47  ;;  %v236_v15 = vld [vmem:[#allocation2 + $0x1a0] sm:$0xff]  ;;  %v394_v26 = vld [vmem:[#allocation2 + $0x290] sm:$0xff]  ;;  %v571_v32 = vld [vmem:[#allocation4 + $0x318] sm:$0xff]  ;;  %v600_v33 = vsub.f32 %v536_v9, %v568_v13  ;;  %v171_v38 = vand.u32 2147483647, %v139_v10  ;;  %v602_v40 = vsub.f32 %v538_v20, %v570_v21 }
  0x4a   :  { %v268_v23 = vld [vmem:[#allocation4 + $0x1a0] sm:$0xff]  ;;  %v426_v27 = vld [vmem:[#allocation4 + $0x290] sm:$0xff]  ;;  %v77_v35 = vld [vmem:[#allocation2 + $0xa8] sm:$0xff]  ;;  %v488_v44 = vand.u32 2147483647, %v456_v17  ;;  %v603_v53 = vsub.f32 %v539_v31, %v571_v32  ;;  %v361_v54 = vadd.f32 %v360_v25, %v330_v24 }
  0x4b   :  { %v515_v19 = vadd.f32 %v514_v8, %v484_v57  ;;  %v109_v36 = vld [vmem:[#allocation4 + $0xa8] sm:$0xff]  ;;  %v395_v39 = vld [vmem:[#allocation2 + $0x298] sm:$0xff]  ;;  %v300_v41 = vsub.f32 %v236_v15, %v268_v23  ;;  %v458_v43 = vsub.f32 %v394_v26, %v426_v27  ;;  %v540_v46 = vld [vmem:[#allocation2 + $0x320] sm:$0xff]  ;;  %v331_v51 = vand.u32 2147483647, %v299_v16 }
  0x4c   :  { %v427_v42 = vld [vmem:[#allocation4 + $0x298] sm:$0xff]  ;;  %v572_v47 = vld [vmem:[#allocation4 + $0x320] sm:$0xff]  ;;  %v237_v49 = vld [vmem:[#allocation2 + $0x1a8] sm:$0xff]  ;;  %v489_v52 = vand.u32 2147483647, %v457_v28  ;;  %v141_v62 = vsub.f32 %v77_v35, %v109_v36  ;;  %v202_v16 = vadd.f32 %v201_v48, %v171_v38 }
  0x4d   :  { %v516_v30 = vadd.f32 %v515_v19, %v485_v7  ;;  %v269_v50 = vld [vmem:[#allocation4 + $0x1a8] sm:$0xff]  ;;  %v632_v58 = vand.u32 2147483647, %v600_v33  ;;  %v633_v59 = vand.u32 2147483647, %v601_v34  ;;  %v78_v60 = vld [vmem:[#allocation2 + $0xb0] sm:$0xff]  ;;  %v459_v1 = vsub.f32 %v395_v39, %v427_v42 }
  0x4e   :  { %v541_v56 = vld [vmem:[#allocation2 + $0x328] sm:$0xff]  ;;  %v110_v61 = vld [vmem:[#allocation4 + $0xb0] sm:$0xff]  ;;  %v396_v63 = vld [vmem:[#allocation2 + $0x2a0] sm:$0xff]  ;;  %v604_v2 = vsub.f32 %v540_v46, %v572_v47  ;;  %v634_v3 = vand.u32 2147483647, %v602_v40  ;;  %v301_v5 = vsub.f32 %v237_v49, %v269_v50  ;;  %v362_v17 = vadd.f32 %v361_v54, %v331_v51 }
  0x4f   :  { %v517_v45 = vadd.f32 %v516_v30, %v486_v18  ;;  %v573_v57 = vld [vmem:[#allocation4 + $0x328] sm:$0xff]  ;;  %v428_v0 = vld [vmem:[#allocation4 + $0x2a0] sm:$0xff]  ;;  %v172_v4 = vand.u32 2147483647, %v140_v37  ;;  %v490_v6 = vand.u32 2147483647, %v458_v43  ;;  %v664_v15 = vadd.f32 %v633_v59, %v632_v58 }
  0x50   :  { %v542_v8 = vld [vmem:[#allocation2 + $0x330] sm:$0xff]  ;;  %v332_v12 = vand.u32 2147483647, %v300_v41  ;;  %v605_v13 = vsub.f32 %v541_v56, %v573_v57  ;;  %v635_v14 = vand.u32 2147483647, %v603_v53  ;;  %v460_v18 = vsub.f32 %v396_v63, %v428_v0  ;;  %v543_v20 = vld [vmem:[#allocation2 + $0x338] sm:$0xff] }
  0x51   :  { %v518_v55 = vadd.f32 %v517_v45, %v487_v29  ;;  %v574_v9 = vld [vmem:[#allocation4 + $0x330] sm:$0xff]  ;;  %v575_v21 = vld [vmem:[#allocation4 + $0x338] sm:$0xff]  ;;  %v397_v23 = vld [vmem:[#allocation2 + $0x2a8] sm:$0xff]  ;;  %v491_v25 = vand.u32 2147483647, %v459_v1  ;;  %v665_v28 = vadd.f32 %v664_v15, %v634_v3  ;;  %v142_v30 = vsub.f32 %v78_v60, %v110_v61 }
  0x52   :  { %v238_v10 = vld [vmem:[#allocation2 + $0x1b0] sm:$0xff]  ;;  %v79_v22 = vld [vmem:[#allocation2 + $0xb8] sm:$0xff]  ;;  %v429_v24 = vld [vmem:[#allocation4 + $0x2a8] sm:$0xff]  ;;  %v606_v26 = vsub.f32 %v542_v8, %v574_v9  ;;  %v636_v27 = vand.u32 2147483647, %v604_v2  ;;  %v607_v39 = vsub.f32 %v543_v20, %v575_v21  ;;  %v203_v42 = vadd.f32 %v202_v16, %v172_v4 }
  0x53   :  { %v519_v7 = vadd.f32 %v518_v55, %v488_v44  ;;  %v270_v11 = vld [vmem:[#allocation4 + $0x1b0] sm:$0xff]  ;;  %v111_v29 = vld [vmem:[#allocation4 + $0xb8] sm:$0xff]  ;;  %v173_v31 = vand.u32 2147483647, %v141_v62  ;;  %v544_v34 = vld [vmem:[#allocation2 + $0x340] sm:$0xff]  ;;  %v666_v41 = vadd.f32 %v665_v28, %v635_v14  ;;  %v363_v43 = vadd.f32 %v362_v17, %v332_v12 }
  0x54   :  { %v302_v32 = vsub.f32 %v238_v10, %v270_v11  ;;  %v576_v35 = vld [vmem:[#allocation4 + $0x340] sm:$0xff]  ;;  %v239_v36 = vld [vmem:[#allocation2 + $0x1b8] sm:$0xff]  ;;  %v333_v38 = vand.u32 2147483647, %v301_v5  ;;  %v637_v40 = vand.u32 2147483647, %v605_v13  ;;  %v461_v44 = vsub.f32 %v397_v23, %v429_v24 }
  0x55   :  { %v520_v19 = vadd.f32 %v519_v7, %v489_v52  ;;  %v271_v37 = vld [vmem:[#allocation4 + $0x1b8] sm:$0xff]  ;;  %v492_v45 = vand.u32 2147483647, %v460_v18  ;;  %v545_v46 = vld [vmem:[#allocation2 + $0x348] sm:$0xff]  ;;  %v80_v48 = vld [vmem:[#allocation2 + $0xc0] sm:$0xff]  ;;  %v608_v52 = vsub.f32 %v544_v34, %v576_v35  ;;  %v667_v54 = vadd.f32 %v666_v41, %v636_v27 }
  0x56   :  { %v577_v47 = vld [vmem:[#allocation4 + $0x348] sm:$0xff]  ;;  %v398_v49 = vld [vmem:[#allocation2 + $0x2b0] sm:$0xff]  ;;  %v638_v53 = vand.u32 2147483647, %v606_v26  ;;  %v112_v55 = vld [vmem:[#allocation4 + $0xc0] sm:$0xff]  ;;  %v143_v56 = vsub.f32 %v79_v22, %v111_v29  ;;  %v303_v58 = vsub.f32 %v239_v36, %v271_v37  ;;  %v204_v3 = vadd.f32 %v203_v42, %v173_v31 }
  0x57   :  { %v521_v33 = vadd.f32 %v520_v19, %v490_v6  ;;  %v430_v50 = vld [vmem:[#allocation4 + $0x2b0] sm:$0xff]  ;;  %v174_v57 = vand.u32 2147483647, %v142_v30  ;;  %v240_v61 = vld [vmem:[#allocation2 + $0x1c0] sm:$0xff]  ;;  %v334_v63 = vand.u32 2147483647, %v302_v32  ;;  %v609_v0 = vsub.f32 %v545_v46, %v577_v47 }
  0x58   :  { %v546_v59 = vld [vmem:[#allocation2 + $0x350] sm:$0xff]  ;;  %v272_v62 = vld [vmem:[#allocation4 + $0x1c0] sm:$0xff]  ;;  %v639_v1 = vand.u32 2147483647, %v607_v39  ;;  %v668_v2 = vadd.f32 %v667_v54, %v637_v40  ;;  %v364_v4 = vadd.f32 %v363_v43, %v333_v38  ;;  %v462_v5 = vsub.f32 %v398_v49, %v430_v50  ;;  %v547_v7 = vld [vmem:[#allocation2 + $0x358] sm:$0xff] }
  0x59   :  { %v522_v51 = vadd.f32 %v521_v33, %v491_v25  ;;  %v578_v60 = vld [vmem:[#allocation4 + $0x350] sm:$0xff]  ;;  %v493_v6 = vand.u32 2147483647, %v461_v44  ;;  %v579_v8 = vld [vmem:[#allocation4 + $0x358] sm:$0xff]  ;;  %v81_v9 = vld [vmem:[#allocation2 + $0xc8] sm:$0xff]  ;;  %v144_v17 = vsub.f32 %v80_v48, %v112_v55  ;;  %v304_v19 = vsub.f32 %v240_v61, %v272_v62 }
  0x5a   :  { %v399_v10 = vld [vmem:[#allocation2 + $0x2b8] sm:$0xff]  ;;  %v610_v13 = vsub.f32 %v546_v59, %v578_v60  ;;  %v640_v14 = vand.u32 2147483647, %v608_v52  ;;  %v669_v15 = vadd.f32 %v668_v2, %v638_v53  ;;  %v113_v16 = vld [vmem:[#allocation4 + $0xc8] sm:$0xff]  ;;  %v175_v18 = vand.u32 2147483647, %v143_v56 }
  0x5b   :  { %v431_v11 = vld [vmem:[#allocation4 + $0x2b8] sm:$0xff]  ;;  %v523_v12 = vadd.f32 %v522_v51, %v492_v45  ;;  %v548_v20 = vld [vmem:[#allocation2 + $0x360] sm:$0xff]  ;;  %v241_v22 = vld [vmem:[#allocation2 + $0x1c8] sm:$0xff]  ;;  %v335_v24 = vand.u32 2147483647, %v303_v58  ;;  %v611_v25 = vsub.f32 %v547_v7, %v579_v8  ;;  %v205_v28 = vadd.f32 %v204_v3, %v174_v57 }
  0x5c   :  { %v580_v21 = vld [vmem:[#allocation4 + $0x360] sm:$0xff]  ;;  %v273_v23 = vld [vmem:[#allocation4 + $0x1c8] sm:$0xff]  ;;  %v641_v26 = vand.u32 2147483647, %v609_v0  ;;  %v670_v27 = vadd.f32 %v669_v15, %v639_v1  ;;  %v365_v29 = vadd.f32 %v364_v4, %v334_v63  ;;  %v463_v30 = vsub.f32 %v399_v10, %v431_v11  ;;  %v82_v34 = vld [vmem:[#allocation2 + $0xd0] sm:$0xff] }
  0x5d   :  { %v494_v31 = vand.u32 2147483647, %v462_v5  ;;  %v549_v32 = vld [vmem:[#allocation2 + $0x368] sm:$0xff]  ;;  %v400_v35 = vld [vmem:[#allocation2 + $0x2c0] sm:$0xff]  ;;  %v524_v37 = vadd.f32 %v523_v12, %v493_v6  ;;  %v612_v38 = vsub.f32 %v548_v20, %v580_v21  ;;  %v642_v39 = vand.u32 2147483647, %v610_v13 }
  0x5e   :  { %v581_v33 = vld [vmem:[#allocation4 + $0x368] sm:$0xff]  ;;  %v432_v36 = vld [vmem:[#allocation4 + $0x2c0] sm:$0xff]  ;;  %v671_v40 = vadd.f32 %v670_v27, %v640_v14  ;;  %v114_v41 = vld [vmem:[#allocation4 + $0xd0] sm:$0xff]  ;;  %v145_v42 = vsub.f32 %v81_v9, %v113_v16  ;;  %v176_v43 = vand.u32 2147483647, %v144_v17  ;;  %v305_v44 = vsub.f32 %v241_v22, %v273_v23 }
  0x5f   :  { %v550_v45 = vld [vmem:[#allocation2 + $0x370] sm:$0xff]  ;;  %v336_v49 = vand.u32 2147483647, %v304_v19  ;;  %v613_v50 = vsub.f32 %v549_v32, %v581_v33  ;;  %v643_v51 = vand.u32 2147483647, %v611_v25  ;;  %v206_v53 = vadd.f32 %v205_v28, %v175_v18  ;;  %v551_v57 = vld [vmem:[#allocation2 + $0x378] sm:$0xff] }
  0x60   :  { %v582_v46 = vld [vmem:[#allocation4 + $0x370] sm:$0xff]  ;;  %v672_v52 = vadd.f32 %v671_v40, %v641_v26  ;;  %v366_v54 = vadd.f32 %v365_v29, %v335_v24  ;;  %v464_v55 = vsub.f32 %v400_v35, %v432_v36  ;;  %v495_v56 = vand.u32 2147483647, %v463_v30  ;;  %v583_v58 = vld [vmem:[#allocation4 + $0x378] sm:$0xff]  ;;  %v401_v60 = vld [vmem:[#allocation2 + $0x2c8] sm:$0xff] }
  0x61   :  { %v242_v47 = vld [vmem:[#allocation2 + $0x1d0] sm:$0xff]  ;;  %v83_v59 = vld [vmem:[#allocation2 + $0xd8] sm:$0xff]  ;;  %v433_v61 = vld [vmem:[#allocation4 + $0x2c8] sm:$0xff]  ;;  %v525_v62 = vadd.f32 %v524_v37, %v494_v31  ;;  %v614_v63 = vsub.f32 %v550_v45, %v582_v46  ;;  %v644_v0 = vand.u32 2147483647, %v612_v38  ;;  %v146_v3 = vsub.f32 %v82_v34, %v114_v41 }
  0x62   :  { %v274_v48 = vld [vmem:[#allocation4 + $0x1d0] sm:$0xff]  ;;  %v673_v1 = vadd.f32 %v672_v52, %v642_v39  ;;  %v115_v2 = vld [vmem:[#allocation4 + $0xd8] sm:$0xff]  ;;  %v177_v4 = vand.u32 2147483647, %v145_v42  ;;  %v552_v6 = vld [vmem:[#allocation2 + $0x380] sm:$0xff]  ;;  %v615_v11 = vsub.f32 %v551_v57, %v583_v58  ;;  %v207_v14 = vadd.f32 %v206_v53, %v176_v43 }
  0x63   :  { %v306_v5 = vsub.f32 %v242_v47, %v274_v48  ;;  %v584_v7 = vld [vmem:[#allocation4 + $0x380] sm:$0xff]  ;;  %v243_v8 = vld [vmem:[#allocation2 + $0x1d8] sm:$0xff]  ;;  %v337_v10 = vand.u32 2147483647, %v305_v44  ;;  %v645_v12 = vand.u32 2147483647, %v613_v50  ;;  %v367_v15 = vadd.f32 %v366_v54, %v336_v49 }
  0x64   :  { %v275_v9 = vld [vmem:[#allocation4 + $0x1d8] sm:$0xff]  ;;  %v674_v13 = vadd.f32 %v673_v1, %v643_v51  ;;  %v465_v16 = vsub.f32 %v401_v60, %v433_v61  ;;  %v496_v17 = vand.u32 2147483647, %v464_v55  ;;  %v553_v18 = vld [vmem:[#allocation2 + $0x388] sm:$0xff]  ;;  %v84_v20 = vld [vmem:[#allocation2 + $0xe0] sm:$0xff]  ;;  %v526_v23 = vadd.f32 %v525_v62, %v495_v56 }
  0x65   :  { %v585_v19 = vld [vmem:[#allocation4 + $0x388] sm:$0xff]  ;;  %v402_v21 = vld [vmem:[#allocation2 + $0x2d0] sm:$0xff]  ;;  %v616_v24 = vsub.f32 %v552_v6, %v584_v7  ;;  %v646_v25 = vand.u32 2147483647, %v614_v63  ;;  %v116_v27 = vld [vmem:[#allocation4 + $0xe0] sm:$0xff]  ;;  %v147_v28 = vsub.f32 %v83_v59, %v115_v2  ;;  %v307_v30 = vsub.f32 %v243_v8, %v275_v9 }
  0x66   :  { %v434_v22 = vld [vmem:[#allocation4 + $0x2d0] sm:$0xff]  ;;  %v675_v26 = vadd.f32 %v674_v13, %v644_v0  ;;  %v178_v29 = vand.u32 2147483647, %v146_v3  ;;  %v244_v33 = vld [vmem:[#allocation2 + $0x1e0] sm:$0xff]  ;;  %v338_v35 = vand.u32 2147483647, %v306_v5  ;;  %v617_v36 = vsub.f32 %v553_v18, %v585_v19 }
  0x67   :  { %v554_v31 = vld [vmem:[#allocation2 + $0x390] sm:$0xff]  ;;  %v276_v34 = vld [vmem:[#allocation4 + $0x1e0] sm:$0xff]  ;;  %v647_v37 = vand.u32 2147483647, %v615_v11  ;;  %v208_v39 = vadd.f32 %v207_v14, %v177_v4  ;;  %v368_v40 = vadd.f32 %v367_v15, %v337_v10  ;;  %v466_v41 = vsub.f32 %v402_v21, %v434_v22  ;;  %v555_v43 = vld [vmem:[#allocation2 + $0x398] sm:$0xff] }
  0x68   :  { %v586_v32 = vld [vmem:[#allocation4 + $0x390] sm:$0xff]  ;;  %v676_v38 = vadd.f32 %v675_v26, %v645_v12  ;;  %v497_v42 = vand.u32 2147483647, %v465_v16  ;;  %v587_v44 = vld [vmem:[#allocation4 + $0x398] sm:$0xff]  ;;  %v85_v45 = vld [vmem:[#allocation2 + $0xe8] sm:$0xff]  ;;  %v527_v48 = vadd.f32 %v526_v23, %v496_v17  ;;  %v148_v53 = vsub.f32 %v84_v20, %v116_v27 }
  0x69   :  { %v403_v46 = vld [vmem:[#allocation2 + $0x2d8] sm:$0xff]  ;;  %v618_v49 = vsub.f32 %v554_v31, %v586_v32  ;;  %v648_v50 = vand.u32 2147483647, %v616_v24  ;;  %v117_v52 = vld [vmem:[#allocation4 + $0xe8] sm:$0xff]  ;;  %v179_v54 = vand.u32 2147483647, %v147_v28  ;;  %v308_v55 = vsub.f32 %v244_v33, %v276_v34 }
  0x6a   :  { %v435_v47 = vld [vmem:[#allocation4 + $0x2d8] sm:$0xff]  ;;  %v677_v51 = vadd.f32 %v676_v38, %v646_v25  ;;  %v556_v56 = vld [vmem:[#allocation2 + $0x3a0] sm:$0xff]  ;;  %v245_v58 = vld [vmem:[#allocation2 + $0x1e8] sm:$0xff]  ;;  %v339_v60 = vand.u32 2147483647, %v307_v30  ;;  %v619_v61 = vsub.f32 %v555_v43, %v587_v44  ;;  %v209_v0 = vadd.f32 %v208_v39, %v178_v29 }
  0x6b   :  { %v588_v57 = vld [vmem:[#allocation4 + $0x3a0] sm:$0xff]  ;;  %v277_v59 = vld [vmem:[#allocation4 + $0x1e8] sm:$0xff]  ;;  %v649_v62 = vand.u32 2147483647, %v617_v36  ;;  %v369_v1 = vadd.f32 %v368_v40, %v338_v35  ;;  %v467_v2 = vsub.f32 %v403_v46, %v435_v47  ;;  %v498_v3 = vand.u32 2147483647, %v466_v41 }
  0x6c   :  { %v678_v63 = vadd.f32 %v677_v51, %v647_v37  ;;  %v557_v4 = vld [vmem:[#allocation2 + $0x3a8] sm:$0xff]  ;;  %v86_v6 = vld [vmem:[#allocation2 + $0xf0] sm:$0xff]  ;;  %v404_v7 = vld [vmem:[#allocation2 + $0x2e0] sm:$0xff]  ;;  %v528_v9 = vadd.f32 %v527_v48, %v497_v42  ;;  %v620_v10 = vsub.f32 %v556_v56, %v588_v57  ;;  %v650_v11 = vand.u32 2147483647, %v618_v49 }
  0x6d   :  { %v589_v5 = vld [vmem:[#allocation4 + $0x3a8] sm:$0xff]  ;;  %v436_v8 = vld [vmem:[#allocation4 + $0x2e0] sm:$0xff]  ;;  %v118_v13 = vld [vmem:[#allocation4 + $0xf0] sm:$0xff]  ;;  %v149_v14 = vsub.f32 %v85_v45, %v117_v52  ;;  %v180_v15 = vand.u32 2147483647, %v148_v53  ;;  %v309_v16 = vsub.f32 %v245_v58, %v277_v59  ;;  %v210_v25 = vadd.f32 %v209_v0, %v179_v54 }
  0x6e   :  { %v679_v12 = vadd.f32 %v678_v63, %v648_v50  ;;  %v558_v17 = vld [vmem:[#allocation2 + $0x3b0] sm:$0xff]  ;;  %v340_v21 = vand.u32 2147483647, %v308_v55  ;;  %v621_v22 = vsub.f32 %v557_v4, %v589_v5  ;;  %v651_v23 = vand.u32 2147483647, %v619_v61  ;;  %v559_v29 = vld [vmem:[#allocation2 + $0x3b8] sm:$0xff] }
  0x6f   :  { %v590_v18 = vld [vmem:[#allocation4 + $0x3b0] sm:$0xff]  ;;  %v370_v26 = vadd.f32 %v369_v1, %v339_v60  ;;  %v468_v27 = vsub.f32 %v404_v7, %v436_v8  ;;  %v499_v28 = vand.u32 2147483647, %v467_v2  ;;  %v591_v30 = vld [vmem:[#allocation4 + $0x3b8] sm:$0xff]  ;;  %v405_v32 = vld [vmem:[#allocation2 + $0x2e8] sm:$0xff]  ;;  %v529_v34 = vadd.f32 %v528_v9, %v498_v3 }
  0x70   :  { %v246_v19 = vld [vmem:[#allocation2 + $0x1f0] sm:$0xff]  ;;  %v680_v24 = vadd.f32 %v679_v12, %v649_v62  ;;  %v87_v31 = vld [vmem:[#allocation2 + $0xf8] sm:$0xff]  ;;  %v437_v33 = vld [vmem:[#allocation4 + $0x2e8] sm:$0xff]  ;;  %v622_v35 = vsub.f32 %v558_v17, %v590_v18  ;;  %v652_v36 = vand.u32 2147483647, %v620_v10  ;;  %v150_v39 = vsub.f32 %v86_v6, %v118_v13 }
  0x71   :  { %v278_v20 = vld [vmem:[#allocation4 + $0x1f0] sm:$0xff]  ;;  %v119_v38 = vld [vmem:[#allocation4 + $0xf8] sm:$0xff]  ;;  %v181_v40 = vand.u32 2147483647, %v149_v14  ;;  %v560_v42 = vld [vmem:[#allocation2 + $0x3c0] sm:$0xff]  ;;  %v623_v47 = vsub.f32 %v559_v29, %v591_v30  ;;  %v211_v50 = vadd.f32 %v210_v25, %v180_v15  ;;  %v371_v51 = vadd.f32 %v370_v26, %v340_v21 }
  0x72   :  { %v681_v37 = vadd.f32 %v680_v24, %v650_v11  ;;  %v310_v41 = vsub.f32 %v246_v19, %v278_v20  ;;  %v592_v43 = vld [vmem:[#allocation4 + $0x3c0] sm:$0xff]  ;;  %v247_v44 = vld [vmem:[#allocation2 + $0x1f8] sm:$0xff]  ;;  %v341_v46 = vand.u32 2147483647, %v309_v16  ;;  %v653_v48 = vand.u32 2147483647, %v621_v22 }
  0x73   :  { %v279_v45 = vld [vmem:[#allocation4 + $0x1f8] sm:$0xff]  ;;  %v469_v52 = vsub.f32 %v405_v32, %v437_v33  ;;  %v500_v53 = vand.u32 2147483647, %v468_v27  ;;  %v561_v54 = vld [vmem:[#allocation2 + $0x3c8] sm:$0xff]  ;;  %v406_v56 = vld [vmem:[#allocation2 + $0x2f0] sm:$0xff]  ;;  %v530_v58 = vadd.f32 %v529_v34, %v499_v28  ;;  %v624_v59 = vsub.f32 %v560_v42, %v592_v43 }
  0x74   :  { %v682_v49 = vadd.f32 %v681_v37, %v651_v23  ;;  %v593_v55 = vld [vmem:[#allocation4 + $0x3c8] sm:$0xff]  ;;  %v438_v57 = vld [vmem:[#allocation4 + $0x2f0] sm:$0xff]  ;;  %v654_v60 = vand.u32 2147483647, %v622_v35  ;;  %v151_v62 = vsub.f32 %v87_v31, %v119_v38  ;;  %v182_v63 = vand.u32 2147483647, %v150_v39 }
  0x75   :  { %v311_v0 = vsub.f32 %v247_v44, %v279_v45  ;;  %v562_v1 = vld [vmem:[#allocation2 + $0x3d0] sm:$0xff]  ;;  %v342_v3 = vand.u32 2147483647, %v310_v41  ;;  %v625_v4 = vsub.f32 %v561_v54, %v593_v55  ;;  %v655_v5 = vand.u32 2147483647, %v623_v47  ;;  %v563_v11 = vld [vmem:[#allocation2 + $0x3d8] sm:$0xff] }
  0x76   :  { %v683_v61 = vadd.f32 %v682_v49, %v652_v36  ;;  %v594_v2 = vld [vmem:[#allocation4 + $0x3d0] sm:$0xff]  ;;  %v212_v7 = vadd.f32 %v211_v50, %v181_v40  ;;  %v372_v8 = vadd.f32 %v371_v51, %v341_v46  ;;  %v470_v9 = vsub.f32 %v406_v56, %v438_v57  ;;  %v595_v12 = vld [vmem:[#allocation4 + $0x3d8] sm:$0xff]  ;;  %v564_v20 = vld [vmem:[#allocation2 + $0x3e0] sm:$0xff] }
  0x77   :  { %v501_v10 = vand.u32 2147483647, %v469_v52  ;;  %v407_v13 = vld [vmem:[#allocation2 + $0x2f8] sm:$0xff]  ;;  %v531_v15 = vadd.f32 %v530_v58, %v500_v53  ;;  %v626_v16 = vsub.f32 %v562_v1, %v594_v2  ;;  %v656_v17 = vand.u32 2147483647, %v624_v59  ;;  %v596_v21 = vld [vmem:[#allocation4 + $0x3e0] sm:$0xff] }
  0x78   :  { %v684_v6 = vadd.f32 %v683_v61, %v653_v48  ;;  %v439_v14 = vld [vmem:[#allocation4 + $0x2f8] sm:$0xff]  ;;  %v183_v19 = vand.u32 2147483647, %v151_v62  ;;  %v343_v22 = vand.u32 2147483647, %v311_v0  ;;  %v627_v23 = vsub.f32 %v563_v11, %v595_v12  ;;  %v565_v30 = vld [vmem:[#allocation2 + $0x3e8] sm:$0xff] }
  0x79   :  { %v657_v24 = vand.u32 2147483647, %v625_v4  ;;  %v213_v26 = vadd.f32 %v212_v7, %v182_v63  ;;  %v373_v27 = vadd.f32 %v372_v8, %v342_v3  ;;  %v471_v28 = vsub.f32 %v407_v13, %v439_v14  ;;  %v597_v31 = vld [vmem:[#allocation4 + $0x3e8] sm:$0xff]  ;;  %v566_v36 = vld [vmem:[#allocation2 + $0x3f0] sm:$0xff]  ;;  %v567_v44 = vld [vmem:[#allocation2 + $0x3f8] sm:$0xff] }
  0x7a   :  { %v685_v18 = vadd.f32 %v684_v6, %v654_v60  ;;  %v502_v29 = vand.u32 2147483647, %v470_v9  ;;  %v532_v32 = vadd.f32 %v531_v15, %v501_v10  ;;  %v628_v33 = vsub.f32 %v564_v20, %v596_v21  ;;  %v598_v37 = vld [vmem:[#allocation4 + $0x3f0] sm:$0xff]  ;;  %v599_v45 = vld [vmem:[#allocation4 + $0x3f8] sm:$0xff] }
  0x7b   :  { %v658_v34 = vand.u32 2147483647, %v626_v16  ;;  %v629_v38 = vsub.f32 %v565_v30, %v597_v31  ;;  %v659_v39 = vand.u32 2147483647, %v627_v23  ;;  %v214_v41 = vadd.f32 %v213_v26, %v183_v19 }
  0x7c   :  { %v686_v25 = vadd.f32 %v685_v18, %v655_v5  ;;  %v374_v42 = vadd.f32 %v373_v27, %v343_v22  ;;  %v503_v43 = vand.u32 2147483647, %v471_v28  ;;  %v533_v46 = vadd.f32 %v532_v32, %v502_v29 }
  0x7d   :  { %v630_v47 = vsub.f32 %v566_v36, %v598_v37  ;;  %v660_v48 = vand.u32 2147483647, %v628_v33  ;;  %v631_v50 = vsub.f32 %v567_v44, %v599_v45  ;;  %v661_v51 = vand.u32 2147483647, %v629_v38 }
  0x7e   :  { %v687_v35 = vadd.f32 %v686_v25, %v656_v17  ;;  %v375_v53 = vadd.f32 %v374_v42, %v214_v41  ;;  %v534_v54 = vadd.f32 %v533_v46, %v503_v43 }
  0x7f   :  { %v662_v55 = vand.u32 2147483647, %v630_v47  ;;  %v663_v57 = vand.u32 2147483647, %v631_v50 }
  0x80   :  { %v688_v40 = vadd.f32 %v687_v35, %v657_v24  ;;  %v535_v59 = vadd.f32 %v534_v54, %v375_v53 }
  0x82   :  { %v689_v49 = vadd.f32 %v688_v40, %v658_v34 }
  0x84   :  { %v690_v52 = vadd.f32 %v689_v49, %v659_v39 }
  0x86   :  { %v691_v56 = vadd.f32 %v690_v52, %v660_v48 }
  0x88   :  { %v692_v58 = vadd.f32 %v691_v56, %v661_v51 }
  0x8a   :  { %v693_v60 = vadd.f32 %v692_v58, %v662_v55 }
  0x8c   :  { %v694_v61 = vadd.f32 %v693_v60, %v663_v57 }
  0x8e   :  { %v695_v62 = vadd.f32 %v694_v61, %v535_v59 }
  0x90   :  { %698 = vst [vmem:[%s790_s2] sm:$0xff] %v695_v62 }
  0x91   :  { %703 = vsyncpa [#allocation3], 1 }
  0x92   :  { %704 = vsyncpa [#allocation5], 1 }

</bundles_post_ra>
